<compile_context>
chip_gen: v7x
topology: tpu7x:2x2x1
jax: 0.10.0
libtpu: 0.0.40
codegen_flags: <defaults>
</compile_context>

<pallas_src>
import math

import jax
import jax.numpy as jnp
import numpy as np
from jax.experimental import pallas as pl
from jax.experimental.pallas import tpu as pltpu


def _round_up(x, m):
    return ((x + m - 1) // m) * m


def _default_tile_n():
    # v5e gets a slightly smaller default tile; everything else uses 64K lanes.
    try:
        kind = jax.devices()[0].device_kind.lower()
    except Exception:
        kind = ""
    return 32768 if "v5" in kind else 65536


# ----------------------------------------------------------------------------
# Pallas kernel: weighted per-sample cross entropy -> one partial sum per tile.
# Layout: classes on sublanes, nodes on lanes; node axis tiled over the grid.
# ----------------------------------------------------------------------------
def _make_renode_ce_kernel(n_real, needs_mask):
    """Builds the per-tile weighted-CE partial-sum kernel (n_real is static)."""

    def kernel(logits_ref, y_ref, w_ref, out_ref):
        i = pl.program_id(0)

        logits = logits_ref[...].astype(jnp.float32)   # [C, T] classes on sublanes
        y = y_ref[...]                                 # [1, T] int32
        w = w_ref[...].astype(jnp.float32)             # [1, T]
        c, t = logits.shape

        # per-node cross entropy: lse(logits) - logits[target]  (sublane reduces)
        m = jnp.max(logits, axis=0, keepdims=True)                              # [1,T]
        lse = m + jnp.log(jnp.sum(jnp.exp(logits - m), axis=0, keepdims=True))  # [1,T]
        cls_ids = jax.lax.broadcasted_iota(jnp.int32, (c, t), 0)
        tgt = jnp.sum(jnp.where(cls_ids == y, logits, 0.0), axis=0, keepdims=True)
        per_node = (lse - tgt) * w                                              # [1,T]

        if needs_mask:
            # Partial last tile: columns >= n_real hold DMA garbage (possibly
            # inf/NaN inside lse); the select zeroes them before the reduce.
            col = jax.lax.broadcasted_iota(jnp.int32, (1, t), 1) + i * t
            per_node = jnp.where(col < n_real, per_node, 0.0)

        # One scalar partial per tile, broadcast into an (8,128)-aligned block
        # (unmasked store; distinct block per grid step -> "parallel" is legal).
        partial = jnp.sum(per_node)
        out_ref[...] = jnp.zeros_like(out_ref) + partial

    return kernel


def renode_forward(logits, y, rn_weight, *, tile_n=None, logits_are_cn=False):
    """Equivalent of ReNode.forward(logits, y) for loss_name='ce'.

    logits: [N, C] (or [C, N] if logits_are_cn=True), y: [N] int, rn_weight: [N].
    """
    if logits_are_cn:
        c, n = logits.shape
        logits_cn = logits
    else:
        n, c = logits.shape
        # TODO(synk): producing logits as [C, N] upstream (classifier output
        # layout) would remove this transpose's extra HBM read+write pass.
        logits_cn = jnp.transpose(logits)

    if tile_n is None:
        tile_n = _default_tile_n()
    tile_n = _round_up(max(int(tile_n), 128), 128)
    tile_n = min(tile_n, _round_up(n, 128))
    grid_n = pl.cdiv(n, tile_n)
    needs_mask = (n % tile_n) != 0

    # Sidebands as free rank-2 views (no pad, no copy); partial tiles are
    # handled entirely in-kernel by the iota < n mask.
    y2d = y.astype(jnp.int32).reshape(1, n)
    w2d = rn_weight.astype(jnp.float32).reshape(1, n)

    # VMEM budget: double-buffered (logits + y + w) tiles, each sublane-padded
    # to 8 rows, plus the tiny output blocks. Set the scoped limit explicitly
    # so a tile that compiles on v6e does not OOM on v5e's 16 MiB default;
    # cap well under v7x's 64 MiB physical VMEM.
    c_pad = _round_up(c, 8)
    per_step_bytes = (c_pad + 8 + 8) * tile_n * 4
    vmem_bytes = 2 * per_step_bytes + 2 * 8 * 128 * 4
    vmem_limit = int(min(56 << 20, max(24 << 20, 2 * vmem_bytes)))

    kernel = _make_renode_ce_kernel(n, needs_mask)

    partials = pl.pallas_call(
        kernel,
        out_shape=jax.ShapeDtypeStruct((grid_n, 8, 128), jnp.float32),
        grid=(grid_n,),
        in_specs=[
            pl.BlockSpec((c, tile_n), lambda i: (0, i)),
            pl.BlockSpec((1, tile_n), lambda i: (0, i)),
            pl.BlockSpec((1, tile_n), lambda i: (0, i)),
        ],
        out_specs=pl.BlockSpec((1, 8, 128), lambda i: (i, 0, 0)),
        compiler_params=pltpu.CompilerParams(
            dimension_semantics=("parallel",),
            vmem_limit_bytes=vmem_limit),
    )(logits_cn, y2d, w2d)

    # Tiny final reduction over grid_n partials (pairwise in XLA), then /N.
    return jnp.sum(partials[:, 0, 0]) / jnp.float32(n)

# TODO(synk): loss_name in {'re-weight','focal','cb-softmax'} branches of
# IMB_LOSS are not implemented in the kernel; only the default 'ce' path is.
# TODO(synk): if xprof shows exposed DMA at step boundaries after the large
# tiles, add pipeline_mode=pl.Buffered(3) on the logits BlockSpec only.


# ----------------------------------------------------------------------------
# Plain-JAX glue reproducing ReNode.calculate() -> rn_weight (one-time setup,
# not the forward hot path; involves matrix inverse and sorting/ranks).
# ----------------------------------------------------------------------------
def index2dense(edge_index, nnode):
    adj = jnp.zeros((nnode, nnode), jnp.float32)
    adj = adj.at[edge_index[0], edge_index[1]].set(1.0)
    return adj


def calculate_rn_weight(y, edge_index, idx_info, train_mask, rn_base, rn_max):
    pagerank_prob = 0.85
    num_nodes = y.shape[0]
    num_cls = int(jnp.max(y)) + 1
    pr_prob = 1.0 - pagerank_prob

    A = index2dense(edge_index, num_nodes)
    A_hat = A + jnp.eye(num_nodes, dtype=jnp.float32)
    deg = jnp.sum(A_hat, axis=1)
    D_inv_sqrt = jnp.diag(1.0 / jnp.sqrt(deg))
    A_hat = D_inv_sqrt @ A_hat @ D_inv_sqrt
    Pi = pr_prob * jnp.linalg.inv(
        jnp.eye(num_nodes, dtype=jnp.float32) - (1.0 - pr_prob) * A_hat)

    gpr_rows = [jnp.mean(Pi[idx_info[c]], axis=0) for c in range(num_cls)]
    gpr = jnp.stack(gpr_rows, axis=0).T                      # [N, C]

    base_w = rn_base
    scale_w = rn_max - rn_base
    assert scale_w in [0.5, 0.75, 1.0, 1.25, 1.5]

    unlabel_mask = ~train_mask
    gpr_sum = jnp.sum(gpr, axis=1)
    gpr_rn = gpr_sum[:, None] - gpr
    label_matrix = jax.nn.one_hot(y, num_cls, dtype=jnp.float32)
    label_matrix = jnp.where(train_mask[:, None], label_matrix, 0.0)

    rn_matrix = Pi @ gpr_rn
    rn_matrix = jnp.sum(rn_matrix * label_matrix, axis=1)
    rn_matrix = jnp.where(unlabel_mask, jnp.max(rn_matrix) + 99.0, rn_matrix)

    train_size = int(jnp.sum(train_mask))
    order = jnp.argsort(rn_matrix)                           # ascending, stable
    rank = jnp.zeros(num_nodes, jnp.int32).at[order].set(
        jnp.arange(num_nodes, dtype=jnp.int32))
    rn_weight = base_w + 0.5 * scale_w * (
        1.0 + jnp.cos(rank.astype(jnp.float32) * math.pi / (train_size - 1)))
    rn_weight = rn_weight * train_mask.astype(jnp.float32)
    return rn_weight[train_mask]                             # [Ntrain]


# ----------------------------------------------------------------------------
if __name__ == "__main__":
    key = jax.random.PRNGKey(0)
    k_edge_s, k_edge_d, k_logits, k_logits2, k_y2, k_w2 = jax.random.split(key, 6)

    # ---- Test 1: full ReNode pipeline on a tiny graph -----------------------
    num_nodes, num_cls, num_edges = 32, 4, 64
    y = jnp.arange(num_nodes, dtype=jnp.int32) % num_cls
    edge_src = jax.random.randint(k_edge_s, (num_edges,), 0, num_nodes)
    edge_dst = jax.random.randint(k_edge_d, (num_edges,), 0, num_nodes)
    edge_index = jnp.stack([edge_src, edge_dst], axis=0)
    train_mask = jnp.arange(num_nodes) < 16                  # 16 training nodes

    idx_info = [
        jnp.nonzero(jnp.logical_and(train_mask, y == c))[0]
        for c in range(num_cls)
    ]
    rn_weight = calculate_rn_weight(y, edge_index, idx_info, train_mask, 0.5, 1.5)

    train_idx = jnp.nonzero(train_mask)[0]
    y_train = y[train_idx]                                   # [16]
    logits = jax.random.normal(k_logits, (train_idx.shape[0], num_cls),
                               dtype=jnp.float32)            # [16, 4]

    out = jax.block_until_ready(renode_forward(logits, y_train, rn_weight))

    lse = jax.scipy.special.logsumexp(logits, axis=1)
    ce = lse - logits[jnp.arange(logits.shape[0]), y_train]
    ref = jnp.sum(ce * rn_weight) / logits.shape[0]
    np.testing.assert_allclose(np.asarray(out), np.asarray(ref),
                               rtol=1e-5, atol=1e-5)

    # ---- Test 2: multi-tile grid with a partial (masked) last block ---------
    n2, c2 = 300, 7
    logits2 = jax.random.normal(k_logits2, (n2, c2), dtype=jnp.float32)
    y2 = jax.random.randint(k_y2, (n2,), 0, c2)
    w2 = jax.random.uniform(k_w2, (n2,), jnp.float32, 0.5, 1.5)

    out2 = jax.block_until_ready(renode_forward(logits2, y2, w2, tile_n=128))

    lse2 = jax.scipy.special.logsumexp(logits2, axis=1)
    ce2 = lse2 - logits2[jnp.arange(n2), y2]
    ref2 = jnp.sum(ce2 * w2) / n2
    np.testing.assert_allclose(np.asarray(out2), np.asarray(ref2),
                               rtol=1e-5, atol=1e-5)

    print("KERNEL_OK")
</pallas_src>

<mosaic_0001>
module attributes {stable_mosaic.version = 11 : i64} {
  func.func @kernel(%arg0: i32, %arg1: memref<4x128xf32, #tpu.memory_space<vmem>>, %arg2: memref<1x128xi32, #tpu.memory_space<vmem>>, %arg3: memref<1x128xf32, #tpu.memory_space<vmem>>, %arg4: memref<1x8x128xf32, #tpu.memory_space<vmem>>) attributes {dimension_semantics = [#tpu.dimension_semantics<parallel>], iteration_bounds = array<i64: 1>, scalar_prefetch = 0 : i64, scratch_operands = 0 : i64, tpu.core_type = #tpu.core_type<tc>, window_params = [{transform_indices = @transform_0, window_bounds = array<i64: 4, 128>}, {transform_indices = @transform_1, window_bounds = array<i64: 1, 128>}, {transform_indices = @transform_2, window_bounds = array<i64: 1, 128>}, {transform_indices = @transform_3, window_bounds = array<i64: 1, 8, 128>}]} {
    %c0 = arith.constant 0 : index
    %c0_0 = arith.constant 0 : index
    %0 = vector.load %arg1[%c0, %c0_0] : memref<4x128xf32, #tpu.memory_space<vmem>>, vector<4x128xf32>
    %c0_1 = arith.constant 0 : index
    %c0_2 = arith.constant 0 : index
    %1 = vector.load %arg2[%c0_1, %c0_2] : memref<1x128xi32, #tpu.memory_space<vmem>>, vector<1x128xi32>
    %c0_3 = arith.constant 0 : index
    %c0_4 = arith.constant 0 : index
    %2 = vector.load %arg3[%c0_3, %c0_4] : memref<1x128xf32, #tpu.memory_space<vmem>>, vector<1x128xf32>
    %cst = arith.constant dense<0xFF800000> : vector<128xf32>
    %3 = vector.multi_reduction <maximumf>, %0, %cst [0] : vector<4x128xf32> to vector<128xf32>
    %4 = vector.shape_cast %3 : vector<128xf32> to vector<1x128xf32>
    %5 = vector.broadcast %4 : vector<1x128xf32> to vector<4x128xf32>
    %6 = arith.subf %0, %5 : vector<4x128xf32>
    %7 = math.exp %6 : vector<4x128xf32>
    %cst_5 = arith.constant dense<0.000000e+00> : vector<128xf32>
    %8 = vector.multi_reduction <add>, %7, %cst_5 [0] : vector<4x128xf32> to vector<128xf32>
    %9 = vector.shape_cast %8 : vector<128xf32> to vector<1x128xf32>
    %10 = math.log %9 : vector<1x128xf32>
    %11 = arith.addf %4, %10 : vector<1x128xf32>
    %12 = tpu.iota {dimensions = array<i32: 0>} : vector<4x128xi32>
    %13 = vector.broadcast %1 : vector<1x128xi32> to vector<4x128xi32>
    %14 = arith.cmpi eq, %12, %13 : vector<4x128xi32>
    %cst_6 = arith.constant 0.000000e+00 : f32
    %15 = vector.broadcast %cst_6 : f32 to vector<4x128xf32>
    %16 = arith.select %14, %0, %15 : vector<4x128xi1>, vector<4x128xf32>
    %cst_7 = arith.constant dense<0.000000e+00> : vector<128xf32>
    %17 = vector.multi_reduction <add>, %16, %cst_7 [0] : vector<4x128xf32> to vector<128xf32>
    %18 = vector.shape_cast %17 : vector<128xf32> to vector<1x128xf32>
    %19 = arith.subf %11, %18 : vector<1x128xf32>
    %20 = arith.mulf %19, %2 : vector<1x128xf32>
    %21 = tpu.iota {dimensions = array<i32: 1>} : vector<1x128xi32>
    %c128_i32 = arith.constant 128 : i32
    %22 = arith.muli %arg0, %c128_i32 : i32
    %23 = vector.broadcast %22 : i32 to vector<1x128xi32>
    %24 = arith.addi %21, %23 : vector<1x128xi32>
    %c16_i32 = arith.constant 16 : i32
    %25 = vector.broadcast %c16_i32 : i32 to vector<1x128xi32>
    %26 = arith.cmpi slt, %24, %25 : vector<1x128xi32>
    %cst_8 = arith.constant 0.000000e+00 : f32
    %27 = vector.broadcast %cst_8 : f32 to vector<1x128xf32>
    %28 = arith.select %26, %20, %27 : vector<1x128xi1>, vector<1x128xf32>
    %29 = vector.shape_cast %28 : vector<1x128xf32> to vector<1x1x128xf32>
    %cst_9 = arith.constant dense<0.000000e+00> : vector<1xf32>
    %30 = vector.multi_reduction <add>, %29, %cst_9 [1, 2] : vector<1x1x128xf32> to vector<1xf32>
    %31 = vector.shape_cast %30 : vector<1xf32> to vector<1x1x1xf32>
    %32 = vector.extract %31[0, 0, 0] : f32 from vector<1x1x1xf32>
    %cst_10 = arith.constant 0.000000e+00 : f32
    %33 = vector.broadcast %cst_10 : f32 to vector<1x8x128xf32>
    %34 = vector.broadcast %32 : f32 to vector<1x8x128xf32>
    %35 = arith.addf %33, %34 : vector<1x8x128xf32>
    %c0_11 = arith.constant 0 : index
    %c0_12 = arith.constant 0 : index
    %c0_13 = arith.constant 0 : index
    %36 = vector.load %arg4[%c0_11, %c0_12, %c0_13] : memref<1x8x128xf32, #tpu.memory_space<vmem>>, vector<1x8x128xf32>
    tpu.vector_store %arg4[%c0_11, %c0_12, %c0_13], %35 {strides = array<i32>} : memref<1x8x128xf32, #tpu.memory_space<vmem>>, vector<1x8x128xf32>,
    return
  }
  func.func @transform_0(%arg0: i32) -> (i32, i32) {
    %c0_i32 = arith.constant 0 : i32
    %c0_i32_0 = arith.constant 0 : i32
    return %c0_i32, %arg0 : i32, i32
  }
  func.func @transform_1(%arg0: i32) -> (i32, i32) {
    %c0_i32 = arith.constant 0 : i32
    %c0_i32_0 = arith.constant 0 : i32
    return %c0_i32, %arg0 : i32, i32
  }
  func.func @transform_2(%arg0: i32) -> (i32, i32) {
    %c0_i32 = arith.constant 0 : i32
    %c0_i32_0 = arith.constant 0 : i32
    return %c0_i32, %arg0 : i32, i32
  }
  func.func @transform_3(%arg0: i32) -> (i32, i32, i32) {
    %c0_i32 = arith.constant 0 : i32
    %c0_i32_0 = arith.constant 0 : i32
    %c0_i32_1 = arith.constant 0 : i32
    return %arg0, %c0_i32, %c0_i32_0 : i32, i32, i32
  }
}

</mosaic_0001>

<bundles_post_ra>
// kernel: tpu_custom_call.1
= control target key start
LH: loop header
LB: loop body
LE: loop exit
PB: predicated region body
PF: predicated region fallthrough
CT: control target
= control target key end

     0   :  { %8 = vsyncpa [#allocation3], 0  ;;  %s216_s0 = inlined_call_operand.hbm [shape: f32[4,16], index: 0, kind: input, shape index: {}]   ;;  %s217_s1 = inlined_call_operand.vmem [shape: s32[1,16], index: 1, kind: input, shape index: {}]   ;;  %s218_s2 = inlined_call_operand.vmem [shape: f32[1,16], index: 2, kind: input, shape index: {}]   ;;  %s219_s3 = inlined_call_operand.hbm [shape: f32[1,8,128], index: 3, kind: output, shape index: {}]  }
   0x1   :  { %9 = vsyncpa [#allocation4], 0  ;;  %s161_s12 = smov [#allocation2]   ;;  %s113_s16 = scalar_lea.hbm %s216_s0, 64 }
   0x2   :  { %s16_s13 = sshll.u32 %s161_s12, 4  ;;  %p114_p0 = scmp.ne.s32.totalorder %s216_s0, %s113_s16  ;;  %s17_s13 = int_to_ptr.vmem [resolvable:$true] %s16_s13 }
   0x3   :  { %p117_p1 = scmp.lt.u32.totalorder %s113_s16, %s216_s0 }
   0x5   :  { %p119_p2 = pnand %p117_p1, %p114_p0 }
   0x7   :  { %122 = shalt.err (!%p119_p2)
}
   0x8   :  { %s123_s21 = scalar_lea.vmem %s17_s13, 64  ;;  %p128_p4 = scmp.lt.s32.totalorder %s17_s13, %s17_s13 }
   0x9   :  { %p124_p3 = scmp.ne.s32.totalorder %s17_s13, %s123_s21  ;;  %p129_p5 = scmp.lt.s32.totalorder %s123_s21, %s123_s21 }
   0xb   :  { %p130_p6 = por %p129_p5, %p128_p4 }
   0xd   :  { %p131_p7 = pnand %p130_p6, %p124_p3 }
   0xf   :  { %134 = shalt.err (!%p131_p7)
}
  0x10   :  { %19 = dma.hbm_to_vmem [thread:$0]  %s216_s0, 64, %s17_s13, [#allocation3]  }
  0x11   :  { %157 = dma.done.wait [#allocation3], 64  }
  0x12   :  { %158 = vsyncadd [#allocation3], 4294967232  ;;  %vm30_vm0 = vcmask 1043456   ;;  %v27_v0 = vld [vmem:[#allocation2] sm:$0xf]  ;;  %v51_v10 = vlaneseq  ;;  %vm75_vm3 = vcmask 1040384  }
  0x13   :  { %v31_v1 = vsel %vm30_vm0, %v27_v0, -inf  ;;  %v104_v12 = vld [vmem:[%s217_s1] ss:$0 sm:$0xff]  ;;  %s162_s26 = smov [#allocation5]  }
  0x14   :  { %v32_v2 = vrot.slane %v31_v1, 4  ;;  %v52_v11 = vshrl.u32 %v51_v10, 7  ;;  %v69_v31 = vand.u32 127, %v51_v10  ;;  %v29_v33 = vld [vmem:[%s218_s2] sm:$0x1]  ;;  %s95_s27 = sshll.u32 %s162_s26, 4  ;;  %s96_s27 = int_to_ptr.vmem [resolvable:$true] %s95_s27 }
  0x15   :  { %s135_s2 = scalar_lea.vmem %s96_s27, 128  ;;  %p140_p9 = scmp.lt.s32.totalorder %s96_s27, %s96_s27 }
  0x16   :  { %v33_v3 = vmax.f32 %v31_v1, %v32_v2  ;;  %vm57_vm1 = vcmp.eq.s32.totalorder %v52_v11, %v104_v12  ;;  %vm73_vm2 = vcmp.lt.s32.totalorder %v69_v31, 16  ;;  %p136_p8 = scmp.ne.s32.totalorder %s96_s27, %s135_s2  ;;  %p141_p10 = scmp.lt.s32.totalorder %s135_s2, %s135_s2 }
  0x17   :  { %v58_v13 = vsel %vm57_vm1, %v27_v0, 0.0 }
  0x18   :  { %v34_v4 = vrot.slane %v33_v3, 2  ;;  %v59_v17 = vsel %vm30_vm0, %v58_v13, 0.0  ;;  %p142_p11 = por %p141_p10, %p140_p9 }
  0x19   :  { %v60_v19 = vrot.slane %v59_v17, 4 }
  0x1a   :  { %v35_v5 = vmax.f32 %v33_v3, %v34_v4  ;;  %p143_p12 = pnand %p142_p11, %p136_p8 }
  0x1b   :  { %v61_v22 = vadd.f32 %v60_v19, %v59_v17 }
  0x1c   :  { %v36_v6 = vrot.slane %v35_v5, 1 }
  0x1d   :  { %v62_v25 = vrot.slane %v61_v22, 2 }
  0x1e   :  { %v37_v7 = vmax.f32 %v35_v5, %v36_v6 }
  0x1f   :  { %v63_v26 = vadd.f32 %v62_v25, %v61_v22 }
  0x20   :  { %v38_v8 = vsub.f32 %v27_v0, %v37_v7 }
  0x21   :  { %v64_v27 = vrot.slane %v63_v26, 1 }
  0x22   :  { %v39_v9 = vmul.f32 1.442695, %v38_v8 }
  0x23   :  { %v65_v30 = vadd.f32 %v64_v27, %v63_v26 }
  0x24   :  { %109 = vpow2.f32 %v39_v9 }
  0x2e   :  { %v110_v14 = vpop.eup %109 }
  0x2f   :  { %v41_v15 = vsel %vm30_vm0, %v110_v14, 0.0 }
  0x30   :  { %v42_v16 = vrot.slane %v41_v15, 4 }
  0x32   :  { %v43_v18 = vadd.f32 %v42_v16, %v41_v15 }
  0x34   :  { %v44_v20 = vrot.slane %v43_v18, 2 }
  0x36   :  { %v45_v21 = vadd.f32 %v44_v20, %v43_v18 }
  0x38   :  { %v46_v23 = vrot.slane %v45_v21, 1 }
  0x3a   :  { %v47_v24 = vadd.f32 %v46_v23, %v45_v21 }
  0x3c   :  { %111 = vlog2.f32 %v47_v24 }
  0x46   :  { %v112_v28 = vpop.eup %111 }
  0x47   :  { %v49_v29 = vmul.f32 0.6931472, %v112_v28 }
  0x49   :  { %v50_v32 = vadd.f32 %v49_v29, %v37_v7 }
  0x4b   :  { %v66_v34 = vsub.f32 %v50_v32, %v65_v30 }
  0x4d   :  { %v67_v35 = vmul.f32 %v66_v34, %v29_v33 }
  0x4f   :  { %v74_v36 = vsel %vm73_vm2, %v67_v35, 0.0 }
  0x50   :  { %v76_v37 = vsel %vm75_vm3, %v74_v36, 0.0 }
  0x51   :  { %77 = vadd.xlane.f32.xlu0 %v76_v37 }
  0xde   :  { %v78_v38 = vpop.xlane.xlu0 %77 }
  0xdf   :  { %v79_v39 = vrot.slane %v78_v38, 4 }
  0xe1   :  { %v80_v40 = vadd.f32 %v79_v39, %v78_v38 }
  0xe3   :  { %v81_v41 = vrot.slane %v80_v40, 2 }
  0xe5   :  { %v82_v42 = vadd.f32 %v81_v41, %v80_v40 }
  0xe7   :  { %v83_v43 = vrot.slane %v82_v42, 1 }
  0xe9   :  { %v84_v44 = vadd.f32 %v83_v43, %v82_v42 }
  0xeb   :  { %105 = vpush %v84_v44 }
 0x11c   :  { %s106_s28 = spop %105 }
 0x11d   :  { %v86_v45 = vstv %s106_s28 }
 0x11e   :  { %88 = vst [vmem:[#allocation5] sm:$0xff] %v86_v45 }
 0x11f   :  { %146 = shalt.err (!%p143_p12)
}
 0x120   :  { %s147_s4 = scalar_lea.hbm %s219_s3, 128 }
 0x121   :  { %p148_p13 = scmp.ne.s32.totalorder %s219_s3, %s147_s4  ;;  %p151_p0 = scmp.lt.u32.totalorder %s147_s4, %s219_s3 }
 0x123   :  { %p153_p1 = pnand %p151_p0, %p148_p13 }
 0x125   :  { %156 = shalt.err (!%p153_p1)
}
 0x126   :  { %98 = dma.vmem_to_hbm [thread:$0]  %s96_s27, 128, %s219_s3, [#allocation4]  }
 0x127   :  { %159 = dma.done.wait [#allocation4], 128  }
 0x128   :  { %160 = vsyncadd [#allocation4], 4294967168 }
 0x129   :  { %102 = vsyncpa [#allocation3], 1 }
 0x12a   :  { %103 = vsyncpa [#allocation4], 1 }

</bundles_post_ra>
